<compile_context>
chip_gen: v7x
topology: tpu7x:2x2x1
jax: 0.10.0
libtpu: 0.0.40
codegen_flags: <defaults>
</compile_context>

<pallas_src>
import jax
import jax.numpy as jnp
from jax.experimental import pallas as pl
from jax.experimental.pallas import tpu as pltpu

RGB_WEIGHT = 1.0
DEPTH_WEIGHT = 0.1
REG_WEIGHT = 0.01

_LANE = 128
_SUBLANE = 8
_MAX_TILE_ROWS = 4096    # 4096 x 128 f32 = 2 MiB per buffer for the big stream
_RESIDENT_ROWS = 2048    # streams <= 2048 rows/core (<=1 MiB f32) load once per core


def _cdiv(a, b):
    return -(-a // b)


def _round_up(a, b):
    return _cdiv(a, b) * b


def _num_tensorcores():
    """2 on multi-TensorCore chips (v7x); 1 on single-TC v5e/v6e."""
    try:
        kind = jax.devices()[0].device_kind.lower()
    except Exception:
        return 1
    return 2 if ("v7" in kind or "7x" in kind) else 1


def _slab_sum(x):
    """(rows, 128) f32 -> (8, 128) partial sums.

    Only folds the sublane-group axis (pure VPU adds); the single cross-lane
    reduction happens on the tiny partial-sum output in the JAX wrapper.
    """
    r = x.shape[0]
    return jnp.sum(x.reshape(r // _SUBLANE, _SUBLANE, _LANE), axis=0)


def _make_kernel(rgb_resident, depth_resident, w_resident, steps_per_core):
    def kernel(rgb_p_ref, rgb_t_ref, d_p_ref, d_t_ref, w_ref, acc_ref):
        step = pl.program_id(1)

        @pl.when(step == 0)
        def _init():
            acc_ref[...] = jnp.zeros_like(acc_ref)

        def add_rgb():
            d = rgb_p_ref[...].astype(jnp.float32) - rgb_t_ref[...].astype(jnp.float32)
            acc_ref[0, 0] += _slab_sum(d * d)

        def add_depth():
            d = d_p_ref[...].astype(jnp.float32) - d_t_ref[...].astype(jnp.float32)
            acc_ref[0, 1] += _slab_sum(jnp.abs(d))

        def add_reg():
            w = w_ref[...].astype(jnp.float32)
            acc_ref[0, 2] += _slab_sum(w * w)

        for add_fn, resident in ((add_rgb, rgb_resident),
                                 (add_depth, depth_resident),
                                 (add_reg, w_resident)):
            if resident and steps_per_core > 1:
                # Block is loaded once per core (index_map ignores the step
                # axis), so only fold it into the accumulator once.
                pl.when(step == 0)(add_fn)
            else:
                add_fn()

    return kernel


def nerf_loss(rgb_pred, rgb_target, depth_pred, depth_target, weights,
              rgb_weight=RGB_WEIGHT, depth_weight=DEPTH_WEIGHT,
              reg_weight=REG_WEIGHT, *, max_tile_rows=_MAX_TILE_ROWS,
              resident_rows=_RESIDENT_ROWS, num_cores=None):
    """Fused NeRFLoss forward. Returns dict of scalar losses (f32)."""
    # TODO(synk): the optional-input variants of the PyTorch module (no depth
    # target / no weights) are not specialized; this kernel fuses the full case.
    ncores = _num_tensorcores() if num_cores is None else int(num_cores)
    resident_rows = min(int(resident_rows), int(max_tile_rows))

    n_rgb = int(rgb_pred.size)
    n_depth = int(depth_pred.size)
    n_w = int(weights.size)

    def rows_of(n):
        return max(_cdiv(n, _LANE), 1)

    rows_max_per_core = _cdiv(max(rows_of(n_rgb), rows_of(n_depth), rows_of(n_w)),
                              ncores)
    steps_per_core = max(1, _cdiv(rows_max_per_core, max_tile_rows))

    def _pack(x):
        """Flatten + reshape lane-dense; zero-pad only when the layout is ragged
        (exact for these sums since padded values are 0)."""
        flat = x.reshape(-1)
        rows = rows_of(flat.shape[0])
        rows_per_core = _cdiv(rows, ncores)
        resident = rows_per_core <= resident_rows
        if resident:
            tile_rows = _round_up(rows_per_core, _SUBLANE)
            n_blocks = ncores
            spec = pl.BlockSpec((tile_rows, _LANE), lambda c, i: (c, 0))
        else:
            tile_rows = _round_up(_cdiv(rows_per_core, steps_per_core), _SUBLANE)
            n_blocks = ncores * steps_per_core
            spec = pl.BlockSpec((tile_rows, _LANE),
                                lambda c, i: (c * steps_per_core + i, 0))
        total = n_blocks * tile_rows * _LANE
        if total != flat.shape[0]:
            flat = jnp.pad(flat, (0, total - flat.shape[0]))
        return flat.reshape(n_blocks * tile_rows, _LANE), spec, resident, tile_rows

    rgb_p, rgb_spec, rgb_res, tr_rgb = _pack(rgb_pred)
    rgb_t, _, _, _ = _pack(rgb_target)
    d_p, d_spec, d_res, tr_d = _pack(depth_pred)
    d_t, _, _, _ = _pack(depth_target)
    w, w_spec, w_res, tr_w = _pack(weights)

    out_shape = jax.ShapeDtypeStruct((ncores, 3, _SUBLANE, _LANE), jnp.float32)
    out_spec = pl.BlockSpec((1, 3, _SUBLANE, _LANE), lambda c, i: (c, 0, 0, 0))

    # VMEM budget derived from the actual (double-buffered) tile footprint.
    footprint = (2 * tr_rgb * _LANE * rgb_p.dtype.itemsize * 2   # rgb pred+target
                 + 2 * tr_d * _LANE * d_p.dtype.itemsize * 2     # depth pred+target
                 + 2 * tr_w * _LANE * w.dtype.itemsize           # weights
                 + 2 * 3 * _SUBLANE * _LANE * 4)                 # accumulator
    vmem_limit = int(min(64 << 20, max(16 << 20, 2 * footprint + (4 << 20))))

    bytes_in = sum(int(a.size) * a.dtype.itemsize
                   for a in (rgb_p, rgb_t, d_p, d_t, w))
    bytes_out = ncores * 3 * _SUBLANE * _LANE * 4
    cost = pl.CostEstimate(flops=3 * (n_rgb + n_depth + n_w),
                           transcendentals=0,
                           bytes_accessed=bytes_in + bytes_out)

    kernel = _make_kernel(rgb_res, d_res, w_res, steps_per_core)

    def _run(axis0_semantics):
        return pl.pallas_call(
            kernel,
            out_shape=out_shape,
            grid_spec=pltpu.PrefetchScalarGridSpec(
                num_scalar_prefetch=0,
                grid=(ncores, steps_per_core),
                in_specs=[rgb_spec, rgb_spec, d_spec, d_spec, w_spec],
                out_specs=out_spec),
            compiler_params=pltpu.CompilerParams(
                dimension_semantics=(axis0_semantics, pltpu.ARBITRARY),
                vmem_limit_bytes=vmem_limit),
            cost_estimate=cost,
        )(rgb_p, rgb_t, d_p, d_t, w)

    if ncores > 1:
        core_parallel = getattr(pltpu, "CORE_PARALLEL", pltpu.PARALLEL)
        try:
            partials = _run(core_parallel)       # shard axis 0 across the TCs
        except Exception:
            partials = _run(pltpu.PARALLEL)      # safe fallback
    else:
        partials = _run(pltpu.ARBITRARY)

    # Tiny finalize (cross-lane reduce of ncores*3*1024 floats) in plain XLA.
    sums = jnp.sum(partials, axis=(0, 2, 3))     # (3,) f32
    rgb_loss = sums[0] / jnp.float32(n_rgb)
    depth_loss = sums[1] / jnp.float32(n_depth)
    reg_loss = sums[2] / jnp.float32(n_w)
    total = (jnp.float32(rgb_weight) * rgb_loss
             + jnp.float32(depth_weight) * depth_loss
             + jnp.float32(reg_weight) * reg_loss)
    return {"rgb": rgb_loss, "depth": depth_loss,
            "regularization": reg_loss, "total": total}


def nerf_loss_ref(rgb_pred, rgb_target, depth_pred, depth_target, weights):
    """Pure-JAX reference mirroring the PyTorch module (f32 math)."""
    f32 = jnp.float32
    rgb = jnp.mean((rgb_pred.astype(f32) - rgb_target.astype(f32)) ** 2)
    depth = jnp.mean(jnp.abs(depth_pred.astype(f32) - depth_target.astype(f32)))
    reg = jnp.mean(weights.astype(f32) ** 2)
    total = RGB_WEIGHT * rgb + DEPTH_WEIGHT * depth + REG_WEIGHT * reg
    return {"rgb": rgb, "depth": depth, "regularization": reg, "total": total}


if __name__ == "__main__":
    key = jax.random.PRNGKey(0)

    def make_inputs(k, n_rays, n_samples, dtype=jnp.float32):
        k1, k2, k3, k4, k5 = jax.random.split(k, 5)
        rgb_p = jax.random.uniform(k1, (n_rays, 3), dtype=jnp.float32)
        rgb_t = jax.random.uniform(k2, (n_rays, 3), dtype=jnp.float32)
        d_p = jax.random.uniform(k3, (n_rays,), dtype=jnp.float32) * 5.0
        d_t = jax.random.uniform(k4, (n_rays,), dtype=jnp.float32) * 5.0
        w = jax.nn.softmax(
            jax.random.normal(k5, (n_rays, n_samples), dtype=jnp.float32), axis=-1)
        return tuple(a.astype(dtype) for a in (rgb_p, rgb_t, d_p, d_t, w))

    def check(args, tol, **kw):
        out = nerf_loss(*args, **kw)
        out = {kk: jax.block_until_ready(v) for kk, v in out.items()}
        ref = nerf_loss_ref(*args)
        for kk in ("rgb", "depth", "regularization", "total"):
            a, b = float(out[kk]), float(ref[kk])
            assert abs(a - b) <= tol + tol * abs(b), (kk, a, b)

    k1, k2, k3 = jax.random.split(key, 3)
    # Small aligned case: everything resident, single step, pad-free weights.
    check(make_inputs(k1, n_rays=128, n_samples=64), tol=1e-5)
    # Ragged sizes: exercises the exact zero-padding path.
    check(make_inputs(k2, n_rays=1000, n_samples=48), tol=1e-5)
    # bf16 inputs with forced multi-step tiling of the weights stream
    # (resident small streams + tiled big stream + multi-step accumulation).
    check(make_inputs(k3, n_rays=2048, n_samples=64, dtype=jnp.bfloat16),
          tol=2e-3, max_tile_rows=128, resident_rows=32)

    print("KERNEL_OK")
</pallas_src>

<mosaic_0001>
module attributes {stable_mosaic.version = 11 : i64} {
  func.func @kernel(%arg0: i32, %arg1: i32, %arg2: memref<8x128xf32, #tpu.memory_space<vmem>>, %arg3: memref<8x128xf32, #tpu.memory_space<vmem>>, %arg4: memref<8x128xf32, #tpu.memory_space<vmem>>, %arg5: memref<8x128xf32, #tpu.memory_space<vmem>>, %arg6: memref<64x128xf32, #tpu.memory_space<vmem>>, %arg7: memref<1x3x8x128xf32, #tpu.memory_space<vmem>>) attributes {dimension_semantics = [#tpu.dimension_semantics<arbitrary>, #tpu.dimension_semantics<arbitrary>], iteration_bounds = array<i64: 1, 1>, scalar_prefetch = 0 : i64, scratch_operands = 0 : i64, tpu.core_type = #tpu.core_type<tc>, window_params = [{transform_indices = @transform_0, window_bounds = array<i64: 8, 128>}, {transform_indices = @transform_1, window_bounds = array<i64: 8, 128>}, {transform_indices = @transform_2, window_bounds = array<i64: 8, 128>}, {transform_indices = @transform_3, window_bounds = array<i64: 8, 128>}, {transform_indices = @transform_4, window_bounds = array<i64: 64, 128>}, {transform_indices = @transform_5, window_bounds = array<i64: 1, 3, 8, 128>}]} {
    %c0_i32 = arith.constant 0 : i32
    %0 = arith.cmpi eq, %arg1, %c0_i32 : i32
    %1 = arith.extui %0 : i1 to i32
    %c0_i32_0 = arith.constant 0 : i32
    %2 = arith.cmpi ne, %1, %c0_i32_0 : i32
    scf.if %2 {
      %cst_34 = arith.constant 0.000000e+00 : f32
      %37 = vector.broadcast %cst_34 : f32 to vector<1x3x8x128xf32>
      %c0_35 = arith.constant 0 : index
      %c0_36 = arith.constant 0 : index
      %c0_37 = arith.constant 0 : index
      %c0_38 = arith.constant 0 : index
      %38 = vector.load %arg7[%c0_35, %c0_36, %c0_37, %c0_38] : memref<1x3x8x128xf32, #tpu.memory_space<vmem>>, vector<1x3x8x128xf32>
      tpu.vector_store %arg7[%c0_35, %c0_36, %c0_37, %c0_38], %37 {strides = array<i32>} : memref<1x3x8x128xf32, #tpu.memory_space<vmem>>, vector<1x3x8x128xf32>,
    } else {
    }
    %c0 = arith.constant 0 : index
    %c0_1 = arith.constant 0 : index
    %3 = vector.load %arg2[%c0, %c0_1] : memref<8x128xf32, #tpu.memory_space<vmem>>, vector<8x128xf32>
    %c0_2 = arith.constant 0 : index
    %c0_3 = arith.constant 0 : index
    %4 = vector.load %arg3[%c0_2, %c0_3] : memref<8x128xf32, #tpu.memory_space<vmem>>, vector<8x128xf32>
    %5 = arith.subf %3, %4 : vector<8x128xf32>
    %c0_4 = arith.constant 0 : index
    %c0_5 = arith.constant 0 : index
    %c0_6 = arith.constant 0 : index
    %c0_7 = arith.constant 0 : index
    %6 = vector.load %arg7[%c0_4, %c0_5, %c0_6, %c0_7] : memref<1x3x8x128xf32, #tpu.memory_space<vmem>>, vector<1x1x8x128xf32>
    %7 = vector.shape_cast %6 : vector<1x1x8x128xf32> to vector<8x128xf32>
    %8 = arith.mulf %5, %5 : vector<8x128xf32>
    %9 = vector.shape_cast %8 : vector<8x128xf32> to vector<1x8x128xf32>
    %cst = arith.constant dense<0.000000e+00> : vector<8x128xf32>
    %10 = vector.multi_reduction <add>, %9, %cst [0] : vector<1x8x128xf32> to vector<8x128xf32>
    %11 = arith.addf %7, %10 : vector<8x128xf32>
    %c0_8 = arith.constant 0 : index
    %c0_9 = arith.constant 0 : index
    %c0_10 = arith.constant 0 : index
    %c0_11 = arith.constant 0 : index
    %12 = vector.load %arg7[%c0_8, %c0_9, %c0_10, %c0_11] : memref<1x3x8x128xf32, #tpu.memory_space<vmem>>, vector<1x1x8x128xf32>
    %13 = vector.shape_cast %12 : vector<1x1x8x128xf32> to vector<8x128xf32>
    %14 = vector.shape_cast %11 : vector<8x128xf32> to vector<1x1x8x128xf32>
    tpu.vector_store %arg7[%c0_8, %c0_9, %c0_10, %c0_11], %14 {strides = array<i32>} : memref<1x3x8x128xf32, #tpu.memory_space<vmem>>, vector<1x1x8x128xf32>,
    %c0_12 = arith.constant 0 : index
    %c0_13 = arith.constant 0 : index
    %15 = vector.load %arg4[%c0_12, %c0_13] : memref<8x128xf32, #tpu.memory_space<vmem>>, vector<8x128xf32>
    %c0_14 = arith.constant 0 : index
    %c0_15 = arith.constant 0 : index
    %16 = vector.load %arg5[%c0_14, %c0_15] : memref<8x128xf32, #tpu.memory_space<vmem>>, vector<8x128xf32>
    %17 = arith.subf %15, %16 : vector<8x128xf32>
    %c0_16 = arith.constant 0 : index
    %c1 = arith.constant 1 : index
    %c0_17 = arith.constant 0 : index
    %c0_18 = arith.constant 0 : index
    %18 = vector.load %arg7[%c0_16, %c1, %c0_17, %c0_18] : memref<1x3x8x128xf32, #tpu.memory_space<vmem>>, vector<1x1x8x128xf32>
    %19 = vector.shape_cast %18 : vector<1x1x8x128xf32> to vector<8x128xf32>
    %20 = math.absf %17 : vector<8x128xf32>
    %21 = vector.shape_cast %20 : vector<8x128xf32> to vector<1x8x128xf32>
    %cst_19 = arith.constant dense<0.000000e+00> : vector<8x128xf32>
    %22 = vector.multi_reduction <add>, %21, %cst_19 [0] : vector<1x8x128xf32> to vector<8x128xf32>
    %23 = arith.addf %19, %22 : vector<8x128xf32>
    %c0_20 = arith.constant 0 : index
    %c1_21 = arith.constant 1 : index
    %c0_22 = arith.constant 0 : index
    %c0_23 = arith.constant 0 : index
    %24 = vector.load %arg7[%c0_20, %c1_21, %c0_22, %c0_23] : memref<1x3x8x128xf32, #tpu.memory_space<vmem>>, vector<1x1x8x128xf32>
    %25 = vector.shape_cast %24 : vector<1x1x8x128xf32> to vector<8x128xf32>
    %26 = vector.shape_cast %23 : vector<8x128xf32> to vector<1x1x8x128xf32>
    tpu.vector_store %arg7[%c0_20, %c1_21, %c0_22, %c0_23], %26 {strides = array<i32>} : memref<1x3x8x128xf32, #tpu.memory_space<vmem>>, vector<1x1x8x128xf32>,
    %c0_24 = arith.constant 0 : index
    %c0_25 = arith.constant 0 : index
    %27 = vector.load %arg6[%c0_24, %c0_25] : memref<64x128xf32, #tpu.memory_space<vmem>>, vector<64x128xf32>
    %c0_26 = arith.constant 0 : index
    %c2 = arith.constant 2 : index
    %c0_27 = arith.constant 0 : index
    %c0_28 = arith.constant 0 : index
    %28 = vector.load %arg7[%c0_26, %c2, %c0_27, %c0_28] : memref<1x3x8x128xf32, #tpu.memory_space<vmem>>, vector<1x1x8x128xf32>
    %29 = vector.shape_cast %28 : vector<1x1x8x128xf32> to vector<8x128xf32>
    %30 = arith.mulf %27, %27 : vector<64x128xf32>
    %31 = vector.shape_cast %30 : vector<64x128xf32> to vector<8x8x128xf32>
    %cst_29 = arith.constant dense<0.000000e+00> : vector<8x128xf32>
    %32 = vector.multi_reduction <add>, %31, %cst_29 [0] : vector<8x8x128xf32> to vector<8x128xf32>
    %33 = arith.addf %29, %32 : vector<8x128xf32>
    %c0_30 = arith.constant 0 : index
    %c2_31 = arith.constant 2 : index
    %c0_32 = arith.constant 0 : index
    %c0_33 = arith.constant 0 : index
    %34 = vector.load %arg7[%c0_30, %c2_31, %c0_32, %c0_33] : memref<1x3x8x128xf32, #tpu.memory_space<vmem>>, vector<1x1x8x128xf32>
    %35 = vector.shape_cast %34 : vector<1x1x8x128xf32> to vector<8x128xf32>
    %36 = vector.shape_cast %33 : vector<8x128xf32> to vector<1x1x8x128xf32>
    tpu.vector_store %arg7[%c0_30, %c2_31, %c0_32, %c0_33], %36 {strides = array<i32>} : memref<1x3x8x128xf32, #tpu.memory_space<vmem>>, vector<1x1x8x128xf32>,
    return
  }
  func.func @transform_0(%arg0: i32, %arg1: i32) -> (i32, i32) {
    %c0_i32 = arith.constant 0 : i32
    %c0_i32_0 = arith.constant 0 : i32
    return %arg0, %c0_i32 : i32, i32
  }
  func.func @transform_1(%arg0: i32, %arg1: i32) -> (i32, i32) {
    %c0_i32 = arith.constant 0 : i32
    %c0_i32_0 = arith.constant 0 : i32
    return %arg0, %c0_i32 : i32, i32
  }
  func.func @transform_2(%arg0: i32, %arg1: i32) -> (i32, i32) {
    %c0_i32 = arith.constant 0 : i32
    %c0_i32_0 = arith.constant 0 : i32
    return %arg0, %c0_i32 : i32, i32
  }
  func.func @transform_3(%arg0: i32, %arg1: i32) -> (i32, i32) {
    %c0_i32 = arith.constant 0 : i32
    %c0_i32_0 = arith.constant 0 : i32
    return %arg0, %c0_i32 : i32, i32
  }
  func.func @transform_4(%arg0: i32, %arg1: i32) -> (i32, i32) {
    %c0_i32 = arith.constant 0 : i32
    %c0_i32_0 = arith.constant 0 : i32
    return %arg0, %c0_i32 : i32, i32
  }
  func.func @transform_5(%arg0: i32, %arg1: i32) -> (i32, i32, i32, i32) {
    %c0_i32 = arith.constant 0 : i32
    %c0_i32_0 = arith.constant 0 : i32
    %c0_i32_1 = arith.constant 0 : i32
    %c0_i32_2 = arith.constant 0 : i32
    return %arg0, %c0_i32, %c0_i32_0, %c0_i32_1 : i32, i32, i32, i32
  }
}

</mosaic_0001>

<bundles_post_ra>
// kernel: tpu_custom_call.1
= control target key start
LH: loop header
LB: loop body
LE: loop exit
PB: predicated region body
PF: predicated region fallthrough
CT: control target
= control target key end

     0   :  { %10 = vsyncpa [#allocation3], 0  ;;  %s379_s0 = inlined_call_operand.hbm [shape: f32[8,128], index: 0, kind: input, shape index: {}]   ;;  %s380_s1 = inlined_call_operand.hbm [shape: f32[8,128], index: 1, kind: input, shape index: {}]   ;;  %s381_s2 = inlined_call_operand.hbm [shape: f32[8,128], index: 2, kind: input, shape index: {}]   ;;  %s382_s3 = inlined_call_operand.vmem [shape: f32[8,128], index: 3, kind: input, shape index: {}]   ;;  %s383_s4 = inlined_call_operand.hbm [shape: f32[64,128], index: 4, kind: input, shape index: {}]   ;;  %s384_s5 = inlined_call_operand.hbm [shape: f32[1,3,8,128], index: 5, kind: output, shape index: {}]  }
   0x1   :  { %11 = vsyncpa [#allocation6], 0 }
   0x2   :  { %12 = vsyncpa [#allocation9], 0 }
   0x3   :  { %13 = vsyncpa [#allocation4], 0  ;;  %s266_s18 = smov [#allocation5]   ;;  %s267_s20 = smov [#allocation2]  }
   0x4   :  { %s30_s19 = sshll.u32 %s266_s18, 4  ;;  %s20_s21 = sshll.u32 %s267_s20, 4  ;;  %s31_s19 = int_to_ptr.vmem [resolvable:$true] %s30_s19  ;;  %s21_s21 = int_to_ptr.vmem [resolvable:$true] %s20_s21 }
   0x5   :  { %s148_s24 = scalar_lea.hbm %s380_s1, 128 }
   0x6   :  { %p149_p0 = scmp.ne.s32.totalorder %s380_s1, %s148_s24  ;;  %p152_p1 = scmp.lt.u32.totalorder %s148_s24, %s380_s1 }
   0x8   :  { %p154_p2 = pnand %p152_p1, %p149_p0 }
   0xa   :  { %157 = shalt.err (!%p154_p2)
}
   0xb   :  { %s158_s29 = scalar_lea.vmem %s31_s19, 128  ;;  %p163_p4 = scmp.lt.s32.totalorder %s31_s19, %s31_s19 }
   0xc   :  { %p159_p3 = scmp.ne.s32.totalorder %s31_s19, %s158_s29  ;;  %p164_p5 = scmp.lt.s32.totalorder %s158_s29, %s158_s29 }
   0xe   :  { %p165_p6 = por %p164_p5, %p163_p4 }
  0x10   :  { %p166_p7 = pnand %p165_p6, %p159_p3 }
  0x12   :  { %169 = shalt.err (!%p166_p7)
}
  0x13   :  { %33 = dma.hbm_to_vmem [thread:$0]  %s380_s1, 128, %s31_s19, [#allocation6]  }
  0x14   :  { %s170_s9 = scalar_lea.hbm %s379_s0, 128 }
  0x15   :  { %p171_p8 = scmp.ne.s32.totalorder %s379_s0, %s170_s9  ;;  %p174_p9 = scmp.lt.u32.totalorder %s170_s9, %s379_s0 }
  0x17   :  { %p176_p10 = pnand %p174_p9, %p171_p8 }
  0x19   :  { %179 = shalt.err (!%p176_p10)
}
  0x1a   :  { %s180_s14 = scalar_lea.vmem %s21_s21, 128  ;;  %p185_p12 = scmp.lt.s32.totalorder %s21_s21, %s21_s21 }
  0x1b   :  { %p181_p11 = scmp.ne.s32.totalorder %s21_s21, %s180_s14  ;;  %p186_p13 = scmp.lt.s32.totalorder %s180_s14, %s180_s14 }
  0x1d   :  { %p187_p0 = por %p186_p13, %p185_p12 }
  0x1f   :  { %p188_p1 = pnand %p187_p0, %p181_p11 }
  0x21   :  { %191 = shalt.err (!%p188_p1)
}
  0x22   :  { %23 = dma.hbm_to_vmem [thread:$0]  %s379_s0, 128, %s21_s21, [#allocation3]  }
  0x23   :  { %s268_s16 = smov [#allocation7]   ;;  %s269_s18 = smov [#allocation8]  }
  0x24   :  { %s40_s17 = sshll.u32 %s268_s16, 4  ;;  %s51_s19 = sshll.u32 %s269_s18, 4  ;;  %s41_s17 = int_to_ptr.vmem [resolvable:$true] %s40_s17  ;;  %s327_s19 = int_to_ptr.vmem [resolvable:$true] %s51_s19 }
  0x25   :  { %s192_s23 = scalar_lea.hbm %s381_s2, 128 }
  0x26   :  { %p193_p2 = scmp.ne.s32.totalorder %s381_s2, %s192_s23  ;;  %p196_p3 = scmp.lt.u32.totalorder %s192_s23, %s381_s2 }
  0x28   :  { %p198_p4 = pnand %p196_p3, %p193_p2 }
  0x2a   :  { %201 = shalt.err (!%p198_p4)
}
  0x2b   :  { %s202_s0 = scalar_lea.vmem %s41_s17, 128  ;;  %p207_p6 = scmp.lt.s32.totalorder %s41_s17, %s41_s17 }
  0x2c   :  { %p203_p5 = scmp.ne.s32.totalorder %s41_s17, %s202_s0  ;;  %p208_p7 = scmp.lt.s32.totalorder %s202_s0, %s202_s0 }
  0x2e   :  { %p209_p8 = por %p208_p7, %p207_p6 }
  0x30   :  { %p210_p9 = pnand %p209_p8, %p203_p5 }
  0x32   :  { %213 = shalt.err (!%p210_p9)
}
  0x33   :  { %43 = dma.hbm_to_vmem [thread:$0]  %s381_s2, 128, %s41_s17, [#allocation6]  }
  0x34   :  { %s214_s6 = scalar_lea.hbm %s383_s4, 1024 }
  0x35   :  { %p215_p10 = scmp.ne.s32.totalorder %s383_s4, %s214_s6  ;;  %p218_p11 = scmp.lt.u32.totalorder %s214_s6, %s383_s4 }
  0x37   :  { %p220_p12 = pnand %p218_p11, %p215_p10 }
  0x39   :  { %223 = shalt.err (!%p220_p12)
}
  0x3a   :  { %s224_s11 = scalar_lea.vmem %s327_s19, 1024  ;;  %p229_p0 = scmp.lt.s32.totalorder %s327_s19, %s327_s19 }
  0x3b   :  { %p225_p13 = scmp.ne.s32.totalorder %s327_s19, %s224_s11  ;;  %p230_p1 = scmp.lt.s32.totalorder %s224_s11, %s224_s11 }
  0x3d   :  { %p231_p2 = por %p230_p1, %p229_p0 }
  0x3f   :  { %p232_p3 = pnand %p231_p2, %p225_p13 }
  0x41   :  { %235 = shalt.err (!%p232_p3)
}
  0x42   :  { %s270_s2 = smov 128   ;;  %s271_s12 = smov 8  }
  0x43   :  { %57 = dma.hbm_to_vmem [thread:$0]  %s383_s4, 1024, %s327_s19, [#allocation9], %s270_s2, %s270_s2, %s271_s12  }
  0x44   :  { %258 = dma.done.wait [#allocation3], 128  }
  0x45   :  { %259 = vsyncadd [#allocation3], 4294967168 }
  0x46   :  { %260 = dma.done.wait [#allocation6], 256  }
  0x47   :  { %261 = vsyncadd [#allocation6], 4294967040 }
  0x48   :  { %262 = dma.done.wait [#allocation9], 1024  }
  0x49   :  { %263 = vsyncadd [#allocation9], 4294966272  ;;  %v77_v0 = vld [vmem:[#allocation2] sm:$0xff]  ;;  %v78_v1 = vld [vmem:[#allocation5] sm:$0xff] }
  0x4a   :  { %v85_v2 = vld [vmem:[#allocation7] sm:$0xff]  ;;  %v79_v3 = vsub.f32 %v77_v0, %v78_v1  ;;  %v86_v4 = vld [vmem:[%s382_s3] sm:$0xff]  ;;  %v94_v5 = vld [vmem:[#allocation8] sm:$0xff]  ;;  %s272_s3 = smov [#allocation10]  }
  0x4b   :  { %v95_v6 = vld [vmem:[#allocation8 + $0x8] sm:$0xff]  ;;  %v87_v7 = vsub.f32 %v85_v2, %v86_v4  ;;  %v96_v8 = vld [vmem:[#allocation8 + $0x10] sm:$0xff]  ;;  %v97_v9 = vld [vmem:[#allocation8 + $0x18] sm:$0xff]  ;;  %v104_v10 = vmul.f32 %v94_v5, %v94_v5  ;;  %s126_s4 = sshll.u32 %s272_s3, 4  ;;  %s127_s4 = int_to_ptr.vmem [resolvable:$true] %s126_s4 }
  0x4c   :  { %v105_v11 = vmul.f32 %v95_v6, %v95_v6  ;;  %v81_v12 = vmul.f32 %v79_v3, %v79_v3  ;;  %v106_v13 = vmul.f32 %v96_v8, %v96_v8  ;;  %v98_v15 = vld [vmem:[#allocation8 + $0x20] sm:$0xff]  ;;  %v107_v16 = vmul.f32 %v97_v9, %v97_v9  ;;  %v99_v18 = vld [vmem:[#allocation8 + $0x28] sm:$0xff]  ;;  %v100_v21 = vld [vmem:[#allocation8 + $0x30] sm:$0xff]  ;;  %s236_s16 = scalar_lea.vmem %s127_s4, 384  ;;  %p241_p5 = scmp.lt.s32.totalorder %s127_s4, %s127_s4 }
  0x4d   :  { %v90_v14 = vand.u32 2147483647, %v87_v7  ;;  %v108_v19 = vmul.f32 %v98_v15, %v98_v15  ;;  %v109_v22 = vmul.f32 %v99_v18, %v99_v18  ;;  %v101_v24 = vld [vmem:[#allocation8 + $0x38] sm:$0xff]  ;;  %v110_v25 = vmul.f32 %v100_v21, %v100_v21  ;;  %p237_p4 = scmp.ne.s32.totalorder %s127_s4, %s236_s16  ;;  %p242_p6 = scmp.lt.s32.totalorder %s236_s16, %s236_s16 }
  0x4e   :  { %v112_v17 = vadd.f32 %v105_v11, %v104_v10  ;;  %84 = vst [vmem:[#allocation10] sm:$0xff] %v81_v12  ;;  %v111_v27 = vmul.f32 %v101_v24, %v101_v24 }
  0x4f   :  { %93 = vst [vmem:[#allocation10 + $0x8] sm:$0xff] %v90_v14  ;;  %p243_p7 = por %p242_p6, %p241_p5 }
  0x50   :  { %v113_v20 = vadd.f32 %v112_v17, %v106_v13 }
  0x51   :  { %p244_p8 = pnand %p243_p7, %p237_p4 }
  0x52   :  { %v114_v23 = vadd.f32 %v113_v20, %v107_v16 }
  0x54   :  { %v115_v26 = vadd.f32 %v114_v23, %v108_v19 }
  0x56   :  { %v116_v28 = vadd.f32 %v115_v26, %v109_v22 }
  0x58   :  { %v117_v29 = vadd.f32 %v116_v28, %v110_v25 }
  0x5a   :  { %v118_v30 = vadd.f32 %v117_v29, %v111_v27 }
  0x5c   :  { %120 = vst [vmem:[#allocation10 + $0x10] sm:$0xff] %v118_v30 }
  0x5d   :  { %247 = shalt.err (!%p244_p8)
}
  0x5e   :  { %s248_s19 = scalar_lea.hbm %s384_s5, 384 }
  0x5f   :  { %p249_p9 = scmp.ne.s32.totalorder %s384_s5, %s248_s19  ;;  %p252_p10 = scmp.lt.u32.totalorder %s248_s19, %s384_s5 }
  0x61   :  { %p254_p11 = pnand %p252_p10, %p249_p9 }
  0x63   :  { %257 = shalt.err (!%p254_p11)
}
  0x64   :  { %132 = dma.vmem_to_hbm [thread:$0]  %s127_s4, 384, %s384_s5, [#allocation4], %s270_s2, %s270_s2, %s271_s12  }
  0x65   :  { %264 = dma.done.wait [#allocation4], 384  }
  0x66   :  { %265 = vsyncadd [#allocation4], 4294966912 }
  0x67   :  { %136 = vsyncpa [#allocation3], 1 }
  0x68   :  { %137 = vsyncpa [#allocation6], 1 }
  0x69   :  { %138 = vsyncpa [#allocation9], 1 }
  0x6a   :  { %139 = vsyncpa [#allocation4], 1 }

</bundles_post_ra>
